<compile_context>
chip_gen: v6e
topology: v6e:2x2x1
jax: 0.10.0
libtpu: 0.0.40
codegen_flags: <defaults>
</compile_context>

<pallas_src>
from typing import NamedTuple

import jax
import jax.numpy as jnp
from jax.experimental import pallas as pl
from jax.experimental.pallas import tpu as pltpu


# ----------------------------------------------------------------------------
# Small helpers
# ----------------------------------------------------------------------------
def _round_up(x, m):
    return (x + m - 1) // m * m


def _pick_tile(dim, align, cap):
    """Largest multiple of `align` that divides `dim` and is <= cap.
    `dim` is always a multiple of `align` here, so this succeeds."""
    best = align
    t = align
    while t <= min(dim, cap):
        if dim % t == 0:
            best = t
        t += align
    return best


def _vmem_budget_bytes():
    """Generation-aware VMEM budget: ~96 MiB on v5e/v6e (128 MiB physical),
    ~48 MiB on v7x (64 MiB physical). Conservative default if the query fails."""
    try:
        cap = pltpu.get_tpu_info().vmem_capacity_bytes
    except Exception:
        cap = 64 * 1024 * 1024
    return min(int(cap) * 3 // 4, 100 * 1024 * 1024)


class FoldedDFF(NamedTuple):
    layers: tuple      # 4 x (w_t bf16 (Kp, Np), ss f32 (2, Np): row0=scale, row1=shift)
    fan_in: int
    fc_out_h: int


# ----------------------------------------------------------------------------
# One-time parameter folding (hoisted out of the forward path)
# ----------------------------------------------------------------------------
def fold_dff_params(params, eps=1e-5):
    """Fold Linear bias + eval-mode BatchNorms (and the scalar BatchNorm2d(1))
    into per-layer (W^T, scale, shift); pad to (8,128) multiples; cast weights
    to bf16. Call once and reuse across forward calls."""
    s0 = params["bn1_gamma"] / jnp.sqrt(params["bn1_var"] + eps)
    t0 = params["bn1_beta"] - params["bn1_mean"] * s0

    fan_in = int(params["lin1_w"].shape[1])
    fc_out_h = int(params["lin1_w"].shape[0])

    layers = []
    for li in range(4):
        w = params[f"lin{li + 1}_w"].astype(jnp.float32)   # (out, in) torch layout
        b = params[f"lin{li + 1}_b"].astype(jnp.float32)   # (out,)
        w_t = w.T                                          # (in, out)
        if li == 0:
            # Fold scalar bn1 affine into lin1:
            #   (s0*x + t0) @ W^T + b = x @ (s0*W^T) + (b + t0 * sum_in W^T)
            b = b + t0 * jnp.sum(w_t, axis=0)
            w_t = w_t * s0

        g = params[f"bn{li + 2}_gamma"]
        bt = params[f"bn{li + 2}_beta"]
        mu = params[f"bn{li + 2}_mean"]
        var = params[f"bn{li + 2}_var"]
        s = g / jnp.sqrt(var + eps)
        scale = s                                          # applied to (x @ W^T)
        shift = (b - mu) * s + bt                          # bias + BN shift

        K, N = w_t.shape
        Kp, Np = _round_up(K, 128), _round_up(N, 128)
        w_t = jnp.pad(w_t, ((0, Kp - K), (0, Np - N))).astype(jnp.bfloat16)
        ss = jnp.stack([jnp.pad(scale, (0, Np - N)),
                        jnp.pad(shift, (0, Np - N))]).astype(jnp.float32)
        layers.append((w_t, ss))

    layers = jax.block_until_ready(tuple(layers))
    return FoldedDFF(layers=layers, fan_in=fan_in, fc_out_h=fc_out_h)


# ----------------------------------------------------------------------------
# Fused 4-layer kernel: activation stays resident in VMEM across layers
# ----------------------------------------------------------------------------
def _dff_fused4_kernel(x_ref, w1_ref, w2_ref, w3_ref, w4_ref,
                       ss1_ref, ss2_ref, ss3_ref, ss4_ref, o_ref):
    # x_ref: (TM, K0p) bf16; w*: bf16; ss*: (2, Np) f32; o_ref: (TM, Np) f32.
    def layer(h_bf16, w_ref, ss_ref):
        y = jnp.dot(h_bf16, w_ref[...], preferred_element_type=jnp.float32)
        ss = ss_ref[...]
        y = y * ss[0:1, :] + ss[1:2, :]
        return jnp.maximum(y, 0.0)

    h = layer(x_ref[...], w1_ref, ss1_ref)
    h = layer(h.astype(jnp.bfloat16), w2_ref, ss2_ref)
    h = layer(h.astype(jnp.bfloat16), w3_ref, ss3_ref)
    o_ref[...] = layer(h.astype(jnp.bfloat16), w4_ref, ss4_ref).astype(o_ref.dtype)


def _fused_vmem_estimate(tm, layers):
    w_bytes = sum(w.size * w.dtype.itemsize + ss.size * ss.dtype.itemsize
                  for (w, ss) in layers)
    K0p, Np = layers[0][0].shape
    io_bytes = tm * K0p * 2 + tm * Np * 4            # x tile (bf16) + out tile (f32)
    interm = 3 * tm * Np * 4                         # in-kernel f32 intermediates
    return 2 * (w_bytes + io_bytes) + interm         # x2 for double-buffering


def _forward_fused(x2d, folded, budget):
    M, K0 = x2d.shape
    (w1, ss1), (w2, ss2), (w3, ss3), (w4, ss4) = folded.layers
    K0p, Np = w1.shape

    tm = min(128, _round_up(M, 8))                   # >=2 M tiles for v7x when M>128
    Mp = _round_up(M, tm)
    xp = jnp.pad(x2d, ((0, Mp - M), (0, K0p - K0))).astype(jnp.bfloat16)

    out = pl.pallas_call(
        _dff_fused4_kernel,
        out_shape=jax.ShapeDtypeStruct((Mp, Np), jnp.float32),
        grid_spec=pltpu.PrefetchScalarGridSpec(
            num_scalar_prefetch=0,
            grid=(Mp // tm,),
            in_specs=[
                pl.BlockSpec((tm, K0p), lambda i: (i, 0)),
                pl.BlockSpec((K0p, Np), lambda i: (0, 0)),
                pl.BlockSpec((Np, Np), lambda i: (0, 0)),
                pl.BlockSpec((Np, Np), lambda i: (0, 0)),
                pl.BlockSpec((Np, Np), lambda i: (0, 0)),
                pl.BlockSpec((2, Np), lambda i: (0, 0)),
                pl.BlockSpec((2, Np), lambda i: (0, 0)),
                pl.BlockSpec((2, Np), lambda i: (0, 0)),
                pl.BlockSpec((2, Np), lambda i: (0, 0)),
            ],
            out_specs=pl.BlockSpec((tm, Np), lambda i: (i, 0)),
        ),
        compiler_params=pltpu.CompilerParams(
            dimension_semantics=("parallel",),
            vmem_limit_bytes=int(budget),
        ),
    )(xp, w1, w2, w3, w4, ss1, ss2, ss3, ss4)
    return out[:M, :folded.fc_out_h]


# ----------------------------------------------------------------------------
# Tiled per-layer fallback (for weight sets too large to keep resident in VMEM)
# ----------------------------------------------------------------------------
def _linear_bn_relu_kernel(x_ref, w_ref, ss_ref, o_ref, acc_ref):
    # x_ref: (TM, TK) bf16; w_ref: (TK, TN) bf16; ss_ref: (2, TN) f32
    # o_ref: (TM, TN); acc_ref: (TM, TN) f32, resident across the K axis.
    k = pl.program_id(2)
    part = jnp.dot(x_ref[...], w_ref[...], preferred_element_type=jnp.float32)

    @pl.when(k == 0)
    def _():
        acc_ref[...] = part           # init with first partial product (no zero-fill)

    @pl.when(k > 0)
    def _():
        acc_ref[...] += part

    @pl.when(k == pl.num_programs(2) - 1)
    def _():
        ss = ss_ref[...]
        y = acc_ref[...] * ss[0:1, :] + ss[1:2, :]
        o_ref[...] = jnp.maximum(y, 0.0).astype(o_ref.dtype)


def _linear_bn_relu(h, w_t, ss, *, out_dtype, tm, tn_cap, tk_cap, vmem_limit):
    Mp, Kp = h.shape
    Kp2, Np = w_t.shape
    assert Kp == Kp2
    tn = _pick_tile(Np, 128, tn_cap)
    tk = _pick_tile(Kp, 128, tk_cap)
    grid = (Mp // tm, Np // tn, Kp // tk)

    return pl.pallas_call(
        _linear_bn_relu_kernel,
        out_shape=jax.ShapeDtypeStruct((Mp, Np), out_dtype),
        grid_spec=pltpu.PrefetchScalarGridSpec(
            num_scalar_prefetch=0,
            grid=grid,
            in_specs=[
                pl.BlockSpec((tm, tk), lambda i, j, k: (i, k)),
                pl.BlockSpec((tk, tn), lambda i, j, k: (k, j)),
                pl.BlockSpec((2, tn), lambda i, j, k: (0, j)),
            ],
            out_specs=pl.BlockSpec((tm, tn), lambda i, j, k: (i, j)),
            scratch_shapes=[pltpu.VMEM((tm, tn), jnp.float32)],
        ),
        compiler_params=pltpu.CompilerParams(
            dimension_semantics=("parallel", "parallel", "arbitrary"),
            vmem_limit_bytes=int(vmem_limit),
        ),
    )(h, w_t, ss)


def _forward_per_layer(x2d, folded, budget):
    M, K0 = x2d.shape
    big = budget >= 80 * 1024 * 1024          # v5e/v6e: larger tiles; v7x: bounded
    tm_cap = 256 if big else 128
    tn_cap = 512 if big else 256
    tk_cap = 1024 if big else 512

    K0p, _ = folded.layers[0][0].shape
    tm = min(tm_cap, _round_up(M, 8))
    Mp = _round_up(M, tm)                     # pad M up to the tile (no tile collapse)

    # Pad once at the input; carry the padded bf16 activation across layers.
    h = jnp.pad(x2d, ((0, Mp - M), (0, K0p - K0))).astype(jnp.bfloat16)
    n_layers = len(folded.layers)
    for li, (w_t, ss) in enumerate(folded.layers):
        out_dtype = jnp.float32 if li == n_layers - 1 else jnp.bfloat16
        h = _linear_bn_relu(h, w_t, ss, out_dtype=out_dtype, tm=tm,
                            tn_cap=tn_cap, tk_cap=tk_cap, vmem_limit=budget)
    return h[:M, :folded.fc_out_h]


# ----------------------------------------------------------------------------
# DFF forward
# ----------------------------------------------------------------------------
def dff_forward(x, folded, *, force_per_layer=False):
    """x: (B, 1, cnn_seg_length, ms_n_mels) -> (B, fc_out_h). Eval-mode DFF."""
    x2d = x.astype(jnp.float32).reshape(-1, folded.fan_in)   # view(-1, fan_in)
    M = x2d.shape[0]
    budget = _vmem_budget_bytes()
    tm = min(128, _round_up(M, 8))
    fits = _fused_vmem_estimate(tm, folded.layers) <= budget - 8 * 1024 * 1024
    if fits and not force_per_layer:
        return _forward_fused(x2d, folded, budget)
    return _forward_per_layer(x2d, folded, budget)


# ----------------------------------------------------------------------------
# References
# ----------------------------------------------------------------------------
def dff_reference_recipe(x, folded):
    """Pure-jnp reference matching the kernels' numeric recipe (folded params,
    bf16 weights/activation handoff, f32 accumulate + epilogue)."""
    h = x.astype(jnp.float32).reshape(-1, folded.fan_in)
    K0p = folded.layers[0][0].shape[0]
    h = jnp.pad(h, ((0, 0), (0, K0p - h.shape[1])))
    for (w_t, ss) in folded.layers:
        hb = h.astype(jnp.bfloat16).astype(jnp.float32)
        wf = w_t.astype(jnp.float32)
        y = hb @ wf
        y = y * ss[0:1, :] + ss[1:2, :]
        h = jnp.maximum(y, 0.0)
    return h[:, :folded.fc_out_h]


def dff_reference_f32(x, params, eps=1e-5):
    """Pure-jnp, full-f32 eval-mode reference of the original module."""
    B = x.shape[0]
    s0 = params["bn1_gamma"] / jnp.sqrt(params["bn1_var"] + eps)
    t0 = params["bn1_beta"] - params["bn1_mean"] * s0
    h = (x.astype(jnp.float32) * s0 + t0).reshape(B, -1)
    for li in range(4):
        w = params[f"lin{li + 1}_w"]
        b = params[f"lin{li + 1}_b"]
        h = h @ w.T + b
        g = params[f"bn{li + 2}_gamma"]
        bt = params[f"bn{li + 2}_beta"]
        mu = params[f"bn{li + 2}_mean"]
        var = params[f"bn{li + 2}_var"]
        h = (h - mu) / jnp.sqrt(var + eps) * g + bt
        h = jnp.maximum(h, 0.0)
    return h


# ----------------------------------------------------------------------------
# Deterministic parameter construction
# ----------------------------------------------------------------------------
def init_dff_params(key, cnn_seg_length, ms_n_mels, fc_out_h):
    fan_in = cnn_seg_length * ms_n_mels
    dims_in = [fan_in, fc_out_h, fc_out_h, fc_out_h]
    params = {}
    keys = iter(jax.random.split(key, 32))

    params["bn1_gamma"] = jnp.float32(1.1)
    params["bn1_beta"] = jnp.float32(0.05)
    params["bn1_mean"] = jnp.float32(0.02)
    params["bn1_var"] = jnp.float32(0.9)

    for li in range(4):
        d_in = dims_in[li]
        params[f"lin{li + 1}_w"] = (
            jax.random.normal(next(keys), (fc_out_h, d_in), jnp.float32) * 0.05)
        params[f"lin{li + 1}_b"] = (
            jax.random.normal(next(keys), (fc_out_h,), jnp.float32) * 0.05)
        params[f"bn{li + 2}_gamma"] = (
            1.0 + 0.1 * jax.random.normal(next(keys), (fc_out_h,), jnp.float32))
        params[f"bn{li + 2}_beta"] = (
            0.1 * jax.random.normal(next(keys), (fc_out_h,), jnp.float32))
        params[f"bn{li + 2}_mean"] = (
            0.1 * jax.random.normal(next(keys), (fc_out_h,), jnp.float32))
        params[f"bn{li + 2}_var"] = (
            0.8 + 0.2 * jax.random.uniform(next(keys), (fc_out_h,), jnp.float32))
    return params


if __name__ == "__main__":
    key = jax.random.PRNGKey(0)
    k_params, k_x = jax.random.split(key)

    # Small shapes consistent with the module: fan_in = cnn_seg_length * ms_n_mels.
    B, cnn_seg_length, ms_n_mels, fc_out_h = 8, 4, 32, 256
    params = init_dff_params(k_params, cnn_seg_length, ms_n_mels, fc_out_h)
    x = jax.random.normal(k_x, (B, 1, cnn_seg_length, ms_n_mels), jnp.float32)

    folded = fold_dff_params(params)               # one-time folding / padding / bf16

    # Primary fused single-kernel path.
    out = jax.block_until_ready(dff_forward(x, folded))
    # Tiled per-layer fallback path (exercised explicitly for coverage).
    out_pl = jax.block_until_ready(dff_forward(x, folded, force_per_layer=True))

    ref_recipe = dff_reference_recipe(x, folded)   # same precision recipe
    ref_f32 = dff_reference_f32(x, params)         # exact eval-mode semantics in f32

    assert out.shape == (B, fc_out_h), out.shape
    assert out_pl.shape == (B, fc_out_h), out_pl.shape
    assert jnp.allclose(out, ref_recipe, atol=2e-2, rtol=2e-2), "fused vs recipe ref"
    assert jnp.allclose(out_pl, ref_recipe, atol=2e-2, rtol=2e-2), "tiled vs recipe ref"
    assert jnp.allclose(out, out_pl, atol=1e-2, rtol=1e-2), "fused vs tiled"
    rel = jnp.linalg.norm(out - ref_f32) / (jnp.linalg.norm(ref_f32) + 1e-6)
    assert float(rel) < 0.1, f"relative error vs f32 reference too large: {rel}"

    print("KERNEL_OK")
</pallas_src>

<mosaic_0001>
module attributes {stable_mosaic.version = 11 : i64} {
  func.func @_dff_fused4_kernel(%arg0: i32, %arg1: memref<8x128xbf16, #tpu.memory_space<vmem>>, %arg2: memref<128x256xbf16, #tpu.memory_space<vmem>>, %arg3: memref<256x256xbf16, #tpu.memory_space<vmem>>, %arg4: memref<256x256xbf16, #tpu.memory_space<vmem>>, %arg5: memref<256x256xbf16, #tpu.memory_space<vmem>>, %arg6: memref<2x256xf32, #tpu.memory_space<vmem>>, %arg7: memref<2x256xf32, #tpu.memory_space<vmem>>, %arg8: memref<2x256xf32, #tpu.memory_space<vmem>>, %arg9: memref<2x256xf32, #tpu.memory_space<vmem>>, %arg10: memref<8x256xf32, #tpu.memory_space<vmem>>) attributes {dimension_semantics = [#tpu.dimension_semantics<parallel>], iteration_bounds = array<i64: 1>, scalar_prefetch = 0 : i64, scratch_operands = 0 : i64, tpu.core_type = #tpu.core_type<tc>, window_params = [{transform_indices = @transform_0, window_bounds = array<i64: 8, 128>}, {pipeline_mode = #tpu.pipeline_mode<synchronous>, transform_indices = @transform_1, window_bounds = array<i64: 128, 256>}, {pipeline_mode = #tpu.pipeline_mode<synchronous>, transform_indices = @transform_2, window_bounds = array<i64: 256, 256>}, {pipeline_mode = #tpu.pipeline_mode<synchronous>, transform_indices = @transform_3, window_bounds = array<i64: 256, 256>}, {pipeline_mode = #tpu.pipeline_mode<synchronous>, transform_indices = @transform_4, window_bounds = array<i64: 256, 256>}, {pipeline_mode = #tpu.pipeline_mode<synchronous>, transform_indices = @transform_5, window_bounds = array<i64: 2, 256>}, {pipeline_mode = #tpu.pipeline_mode<synchronous>, transform_indices = @transform_6, window_bounds = array<i64: 2, 256>}, {pipeline_mode = #tpu.pipeline_mode<synchronous>, transform_indices = @transform_7, window_bounds = array<i64: 2, 256>}, {pipeline_mode = #tpu.pipeline_mode<synchronous>, transform_indices = @transform_8, window_bounds = array<i64: 2, 256>}, {transform_indices = @transform_9, window_bounds = array<i64: 8, 256>}]} {
    %c0 = arith.constant 0 : index
    %c0_0 = arith.constant 0 : index
    %0 = vector.load %arg1[%c0, %c0_0] : memref<8x128xbf16, #tpu.memory_space<vmem>>, vector<8x128xbf16>
    %c0_1 = arith.constant 0 : index
    %c0_2 = arith.constant 0 : index
    %1 = vector.load %arg2[%c0_1, %c0_2] : memref<128x256xbf16, #tpu.memory_space<vmem>>, vector<128x256xbf16>
    %cst = arith.constant dense<0.000000e+00> : vector<8x256xf32>
    %2 = tpu.matmul %0, %1, %cst {dimension_numbers = #tpu.dot_dimension_numbers<[1], [0], [0], [1], [0, 0, 1, 1], [], []>} : vector<8x128xbf16>, vector<128x256xbf16>, vector<8x256xf32> -> vector<8x256xf32>
    %c0_3 = arith.constant 0 : index
    %c0_4 = arith.constant 0 : index
    %3 = vector.load %arg6[%c0_3, %c0_4] : memref<2x256xf32, #tpu.memory_space<vmem>>, vector<2x256xf32>
    %4 = vector.extract_strided_slice %3 {offsets = [0, 0], sizes = [1, 256], strides = [1, 1]} : vector<2x256xf32> to vector<1x256xf32>
    %5 = vector.broadcast %4 : vector<1x256xf32> to vector<8x256xf32>
    %6 = arith.mulf %2, %5 : vector<8x256xf32>
    %7 = vector.extract_strided_slice %3 {offsets = [1, 0], sizes = [1, 256], strides = [1, 1]} : vector<2x256xf32> to vector<1x256xf32>
    %8 = vector.broadcast %7 : vector<1x256xf32> to vector<8x256xf32>
    %9 = arith.addf %6, %8 : vector<8x256xf32>
    %cst_5 = arith.constant 0.000000e+00 : f32
    %10 = vector.broadcast %cst_5 : f32 to vector<8x256xf32>
    %11 = arith.maximumf %9, %10 : vector<8x256xf32>
    %12 = arith.truncf %11 : vector<8x256xf32> to vector<8x256xbf16>
    %c0_6 = arith.constant 0 : index
    %c0_7 = arith.constant 0 : index
    %13 = vector.load %arg3[%c0_6, %c0_7] : memref<256x256xbf16, #tpu.memory_space<vmem>>, vector<256x256xbf16>
    %cst_8 = arith.constant dense<0.000000e+00> : vector<8x256xf32>
    %14 = tpu.matmul %12, %13, %cst_8 {dimension_numbers = #tpu.dot_dimension_numbers<[1], [0], [0], [1], [0, 0, 1, 1], [], []>} : vector<8x256xbf16>, vector<256x256xbf16>, vector<8x256xf32> -> vector<8x256xf32>
    %c0_9 = arith.constant 0 : index
    %c0_10 = arith.constant 0 : index
    %15 = vector.load %arg7[%c0_9, %c0_10] : memref<2x256xf32, #tpu.memory_space<vmem>>, vector<2x256xf32>
    %16 = vector.extract_strided_slice %15 {offsets = [0, 0], sizes = [1, 256], strides = [1, 1]} : vector<2x256xf32> to vector<1x256xf32>
    %17 = vector.broadcast %16 : vector<1x256xf32> to vector<8x256xf32>
    %18 = arith.mulf %14, %17 : vector<8x256xf32>
    %19 = vector.extract_strided_slice %15 {offsets = [1, 0], sizes = [1, 256], strides = [1, 1]} : vector<2x256xf32> to vector<1x256xf32>
    %20 = vector.broadcast %19 : vector<1x256xf32> to vector<8x256xf32>
    %21 = arith.addf %18, %20 : vector<8x256xf32>
    %cst_11 = arith.constant 0.000000e+00 : f32
    %22 = vector.broadcast %cst_11 : f32 to vector<8x256xf32>
    %23 = arith.maximumf %21, %22 : vector<8x256xf32>
    %24 = arith.truncf %23 : vector<8x256xf32> to vector<8x256xbf16>
    %c0_12 = arith.constant 0 : index
    %c0_13 = arith.constant 0 : index
    %25 = vector.load %arg4[%c0_12, %c0_13] : memref<256x256xbf16, #tpu.memory_space<vmem>>, vector<256x256xbf16>
    %cst_14 = arith.constant dense<0.000000e+00> : vector<8x256xf32>
    %26 = tpu.matmul %24, %25, %cst_14 {dimension_numbers = #tpu.dot_dimension_numbers<[1], [0], [0], [1], [0, 0, 1, 1], [], []>} : vector<8x256xbf16>, vector<256x256xbf16>, vector<8x256xf32> -> vector<8x256xf32>
    %c0_15 = arith.constant 0 : index
    %c0_16 = arith.constant 0 : index
    %27 = vector.load %arg8[%c0_15, %c0_16] : memref<2x256xf32, #tpu.memory_space<vmem>>, vector<2x256xf32>
    %28 = vector.extract_strided_slice %27 {offsets = [0, 0], sizes = [1, 256], strides = [1, 1]} : vector<2x256xf32> to vector<1x256xf32>
    %29 = vector.broadcast %28 : vector<1x256xf32> to vector<8x256xf32>
    %30 = arith.mulf %26, %29 : vector<8x256xf32>
    %31 = vector.extract_strided_slice %27 {offsets = [1, 0], sizes = [1, 256], strides = [1, 1]} : vector<2x256xf32> to vector<1x256xf32>
    %32 = vector.broadcast %31 : vector<1x256xf32> to vector<8x256xf32>
    %33 = arith.addf %30, %32 : vector<8x256xf32>
    %cst_17 = arith.constant 0.000000e+00 : f32
    %34 = vector.broadcast %cst_17 : f32 to vector<8x256xf32>
    %35 = arith.maximumf %33, %34 : vector<8x256xf32>
    %36 = arith.truncf %35 : vector<8x256xf32> to vector<8x256xbf16>
    %c0_18 = arith.constant 0 : index
    %c0_19 = arith.constant 0 : index
    %37 = vector.load %arg5[%c0_18, %c0_19] : memref<256x256xbf16, #tpu.memory_space<vmem>>, vector<256x256xbf16>
    %cst_20 = arith.constant dense<0.000000e+00> : vector<8x256xf32>
    %38 = tpu.matmul %36, %37, %cst_20 {dimension_numbers = #tpu.dot_dimension_numbers<[1], [0], [0], [1], [0, 0, 1, 1], [], []>} : vector<8x256xbf16>, vector<256x256xbf16>, vector<8x256xf32> -> vector<8x256xf32>
    %c0_21 = arith.constant 0 : index
    %c0_22 = arith.constant 0 : index
    %39 = vector.load %arg9[%c0_21, %c0_22] : memref<2x256xf32, #tpu.memory_space<vmem>>, vector<2x256xf32>
    %40 = vector.extract_strided_slice %39 {offsets = [0, 0], sizes = [1, 256], strides = [1, 1]} : vector<2x256xf32> to vector<1x256xf32>
    %41 = vector.broadcast %40 : vector<1x256xf32> to vector<8x256xf32>
    %42 = arith.mulf %38, %41 : vector<8x256xf32>
    %43 = vector.extract_strided_slice %39 {offsets = [1, 0], sizes = [1, 256], strides = [1, 1]} : vector<2x256xf32> to vector<1x256xf32>
    %44 = vector.broadcast %43 : vector<1x256xf32> to vector<8x256xf32>
    %45 = arith.addf %42, %44 : vector<8x256xf32>
    %cst_23 = arith.constant 0.000000e+00 : f32
    %46 = vector.broadcast %cst_23 : f32 to vector<8x256xf32>
    %47 = arith.maximumf %45, %46 : vector<8x256xf32>
    %c0_24 = arith.constant 0 : index
    %c0_25 = arith.constant 0 : index
    %48 = vector.load %arg10[%c0_24, %c0_25] : memref<8x256xf32, #tpu.memory_space<vmem>>, vector<8x256xf32>
    tpu.vector_store %arg10[%c0_24, %c0_25], %47 {strides = array<i32>} : memref<8x256xf32, #tpu.memory_space<vmem>>, vector<8x256xf32>,
    return
  }
  func.func @transform_0(%arg0: i32) -> (i32, i32) {
    %c0_i32 = arith.constant 0 : i32
    %c0_i32_0 = arith.constant 0 : i32
    return %arg0, %c0_i32 : i32, i32
  }
  func.func @transform_1(%arg0: i32) -> (i32, i32) {
    %c0_i32 = arith.constant 0 : i32
    %c0_i32_0 = arith.constant 0 : i32
    %c0_i32_1 = arith.constant 0 : i32
    return %c0_i32, %c0_i32_0 : i32, i32
  }
  func.func @transform_2(%arg0: i32) -> (i32, i32) {
    %c0_i32 = arith.constant 0 : i32
    %c0_i32_0 = arith.constant 0 : i32
    %c0_i32_1 = arith.constant 0 : i32
    return %c0_i32, %c0_i32_0 : i32, i32
  }
  func.func @transform_3(%arg0: i32) -> (i32, i32) {
    %c0_i32 = arith.constant 0 : i32
    %c0_i32_0 = arith.constant 0 : i32
    %c0_i32_1 = arith.constant 0 : i32
    return %c0_i32, %c0_i32_0 : i32, i32
  }
  func.func @transform_4(%arg0: i32) -> (i32, i32) {
    %c0_i32 = arith.constant 0 : i32
    %c0_i32_0 = arith.constant 0 : i32
    %c0_i32_1 = arith.constant 0 : i32
    return %c0_i32, %c0_i32_0 : i32, i32
  }
  func.func @transform_5(%arg0: i32) -> (i32, i32) {
    %c0_i32 = arith.constant 0 : i32
    %c0_i32_0 = arith.constant 0 : i32
    %c0_i32_1 = arith.constant 0 : i32
    return %c0_i32, %c0_i32_0 : i32, i32
  }
  func.func @transform_6(%arg0: i32) -> (i32, i32) {
    %c0_i32 = arith.constant 0 : i32
    %c0_i32_0 = arith.constant 0 : i32
    %c0_i32_1 = arith.constant 0 : i32
    return %c0_i32, %c0_i32_0 : i32, i32
  }
  func.func @transform_7(%arg0: i32) -> (i32, i32) {
    %c0_i32 = arith.constant 0 : i32
    %c0_i32_0 = arith.constant 0 : i32
    %c0_i32_1 = arith.constant 0 : i32
    return %c0_i32, %c0_i32_0 : i32, i32
  }
  func.func @transform_8(%arg0: i32) -> (i32, i32) {
    %c0_i32 = arith.constant 0 : i32
    %c0_i32_0 = arith.constant 0 : i32
    %c0_i32_1 = arith.constant 0 : i32
    return %c0_i32, %c0_i32_0 : i32, i32
  }
  func.func @transform_9(%arg0: i32) -> (i32, i32) {
    %c0_i32 = arith.constant 0 : i32
    %c0_i32_0 = arith.constant 0 : i32
    return %arg0, %c0_i32 : i32, i32
  }
}

</mosaic_0001>

<bundles_post_ra>
// kernel: tpu_custom_call.1
= control target key start
LH: loop header
LB: loop body
LE: loop exit
PB: predicated region body
PF: predicated region fallthrough
CT: control target
= control target key end

     0   :  { %14 = vsyncpa [#allocation3], 0  ;;  %s1733_s0 = inlined_call_operand.hbm [shape: bf16[8,128], index: 0, kind: input, shape index: {}]   ;;  %s1734_s1 = inlined_call_operand.hbm [shape: bf16[128,256], index: 1, kind: input, shape index: {}]   ;;  %s1735_s2 = inlined_call_operand.hbm [shape: bf16[256,256], index: 2, kind: input, shape index: {}]   ;;  %s1736_s3 = inlined_call_operand.hbm [shape: bf16[256,256], index: 3, kind: input, shape index: {}]   ;;  %s1737_s4 = inlined_call_operand.hbm [shape: bf16[256,256], index: 4, kind: input, shape index: {}]   ;;  %s1738_s5 = inlined_call_operand.vmem [shape: f32[2,256], index: 5, kind: input, shape index: {}]   ;;  %s1739_s6 = inlined_call_operand.vmem [shape: f32[2,256], index: 6, kind: input, shape index: {}]   ;;  %s1740_s7 = inlined_call_operand.vmem [shape: f32[2,256], index: 7, kind: input, shape index: {}]   ;;  %s1741_s8 = inlined_call_operand.hbm [shape: f32[2,256], index: 8, kind: input, shape index: {}]   ;;  %s1742_s9 = inlined_call_operand.hbm [shape: f32[8,256], index: 9, kind: output, shape index: {}]  }
   0x1   :  { %15 = vsyncpa [#allocation6], 0 }
   0x2   :  { %16 = vsyncpa [#allocation9], 0 }
   0x3   :  { %17 = vsyncpa [#allocation12], 0 }
   0x4   :  { %18 = vsyncpa [#allocation4], 0  ;;  %s1591_s30 = smov [#allocation5]  }
   0x5   :  { %s34_s10 = sshll.u32 %s1591_s30, 4  ;;  %s35_s10 = int_to_ptr.vmem [resolvable:$true] %s34_s10 }
   0x6   :  { %s1449_s11 = scalar_lea.vmem %s35_s10, 2048  ;;  %p1454_p1 = scmp.lt.s32.totalorder %s35_s10, %s35_s10 }
   0x7   :  { %p1450_p0 = scmp.ne.s32.totalorder %s35_s10, %s1449_s11  ;;  %p1455_p2 = scmp.lt.s32.totalorder %s1449_s11, %s1449_s11 }
   0x9   :  { %p1456_p3 = por %p1455_p2, %p1454_p1 }
   0xb   :  { %p1457_p4 = pnand %p1456_p3, %p1450_p0 }
   0xd   :  { %1460 = shalt.err (!%p1457_p4)
}
   0xe   :  { %s1592_s12 = smov 128   ;;  %s1593_s13 = smov 8  }
   0xf   :  { %40 = dma.hbm_to_vmem [thread:$0]  %s1734_s1, 2048, %s35_s10, [#allocation6], %s1592_s12, %s1592_s12, %s1593_s13  }
  0x10   :  { %s1594_s16 = smov [#allocation8]   ;;  %s1595_s18 = smov [#allocation2]  }
  0x11   :  { %s58_s17 = sshll.u32 %s1594_s16, 4  ;;  %s25_s19 = sshll.u32 %s1595_s18, 4  ;;  %s59_s17 = int_to_ptr.vmem [resolvable:$true] %s58_s17  ;;  %s26_s19 = int_to_ptr.vmem [resolvable:$true] %s25_s19 }
  0x12   :  { %s1469_s20 = scalar_lea.vmem %s59_s17, 4096  ;;  %p1474_p6 = scmp.lt.s32.totalorder %s59_s17, %s59_s17 }
  0x13   :  { %p1470_p5 = scmp.ne.s32.totalorder %s59_s17, %s1469_s20  ;;  %p1475_p7 = scmp.lt.s32.totalorder %s1469_s20, %s1469_s20 }
  0x15   :  { %p1476_p8 = por %p1475_p7, %p1474_p6 }
  0x17   :  { %p1477_p9 = pnand %p1476_p8, %p1470_p5 }
  0x19   :  { %1480 = shalt.err (!%p1477_p9)
}
  0x1a   :  { %64 = dma.hbm_to_vmem [thread:$0]  %s1736_s3, 4096, %s59_s17, [#allocation9], %s1592_s12, %s1592_s12, %s1593_s13  }
  0x1b   :  { %s1489_s1 = scalar_lea.vmem %s26_s19, 64  ;;  %p1494_p11 = scmp.lt.s32.totalorder %s26_s19, %s26_s19 }
  0x1c   :  { %p1490_p10 = scmp.ne.s32.totalorder %s26_s19, %s1489_s1  ;;  %p1495_p12 = scmp.lt.s32.totalorder %s1489_s1, %s1489_s1 }
  0x1e   :  { %p1496_p13 = por %p1495_p12, %p1494_p11 }
  0x20   :  { %p1497_p0 = pnand %p1496_p13, %p1490_p10 }
  0x22   :  { %1500 = shalt.err (!%p1497_p0)
}
  0x23   :  { %28 = dma.hbm_to_vmem [thread:$0]  %s1733_s0, 64, %s26_s19, [#allocation3]  }
  0x24   :  { %s1596_s25 = smov [#allocation7]   ;;  %s1597_s27 = smov [#allocation10]  }
  0x25   :  { %s46_s26 = sshll.u32 %s1596_s25, 4  ;;  %s70_s28 = sshll.u32 %s1597_s27, 4  ;;  %s47_s26 = int_to_ptr.vmem [resolvable:$true] %s46_s26  ;;  %s71_s28 = int_to_ptr.vmem [resolvable:$true] %s70_s28 }
  0x26   :  { %s1509_s29 = scalar_lea.vmem %s47_s26, 4096  ;;  %p1514_p2 = scmp.lt.s32.totalorder %s47_s26, %s47_s26 }
  0x27   :  { %p1510_p1 = scmp.ne.s32.totalorder %s47_s26, %s1509_s29  ;;  %p1515_p3 = scmp.lt.s32.totalorder %s1509_s29, %s1509_s29 }
  0x29   :  { %p1516_p4 = por %p1515_p3, %p1514_p2 }
  0x2b   :  { %p1517_p5 = pnand %p1516_p4, %p1510_p1 }
  0x2d   :  { %1520 = shalt.err (!%p1517_p5)
}
  0x2e   :  { %52 = dma.hbm_to_vmem [thread:$0]  %s1735_s2, 4096, %s47_s26, [#allocation6], %s1592_s12, %s1592_s12, %s1593_s13  }
  0x2f   :  { %s1529_s0 = scalar_lea.vmem %s71_s28, 4096  ;;  %p1534_p7 = scmp.lt.s32.totalorder %s71_s28, %s71_s28 }
  0x30   :  { %p1530_p6 = scmp.ne.s32.totalorder %s71_s28, %s1529_s0  ;;  %p1535_p8 = scmp.lt.s32.totalorder %s1529_s0, %s1529_s0 }
  0x32   :  { %p1536_p9 = por %p1535_p8, %p1534_p7 }
  0x34   :  { %p1537_p10 = pnand %p1536_p9, %p1530_p6 }
  0x36   :  { %1540 = shalt.err (!%p1537_p10)
}
  0x37   :  { %76 = dma.hbm_to_vmem [thread:$0]  %s1737_s4, 4096, %s71_s28, [#allocation9], %s1592_s12, %s1592_s12, %s1593_s13  }
  0x38   :  { %s1598_s14 = smov [#allocation11]  }
  0x39   :  { %s89_s15 = sshll.u32 %s1598_s14, 4  ;;  %s90_s15 = int_to_ptr.vmem [resolvable:$true] %s89_s15 }
  0x3a   :  { %s1549_s16 = scalar_lea.vmem %s90_s15, 64  ;;  %p1554_p12 = scmp.lt.s32.totalorder %s90_s15, %s90_s15 }
  0x3b   :  { %p1550_p11 = scmp.ne.s32.totalorder %s90_s15, %s1549_s16  ;;  %p1555_p13 = scmp.lt.s32.totalorder %s1549_s16, %s1549_s16 }
  0x3d   :  { %p1556_p0 = por %p1555_p13, %p1554_p12 }
  0x3f   :  { %p1557_p1 = pnand %p1556_p0, %p1550_p11 }
  0x41   :  { %1560 = shalt.err (!%p1557_p1)
}
  0x42   :  { %92 = dma.hbm_to_vmem [thread:$0]  %s1741_s8, 64, %s90_s15, [#allocation12]  }
  0x43   :  { %1581 = dma.done.wait [#allocation3], 64  }
  0x44   :  { %1582 = vsyncadd [#allocation3], 4294967232 }
  0x45   :  { %1583 = dma.done.wait [#allocation6], 6144  }
  0x46   :  { %1584 = vsyncadd [#allocation6], 4294961152 }
  0x47   :  { %1585 = dma.done.wait [#allocation9], 8192  }
  0x48   :  { %1586 = vsyncadd [#allocation9], 4294959104 }
  0x49   :  { %1587 = dma.done.wait [#allocation12], 64  }
  0x4a   :  { %1588 = vsyncadd [#allocation12], 4294967232  ;;  %v1599_v0 = vmov 0   ;;  %v1273_v1 = vld [vmem:[#allocation5 + $0x74] ss:$8 sps:$4 sm:$0xff]  }
  0x4b   :  { %241 = vmatprep.mubr.bf16.mxu0 %v1599_v0  ;;  %v1275_v2 = vld [vmem:[#allocation5 + $0x70] ss:$8 sps:$4 sm:$0xff]   ;;  %209 = vmatprep.subr.bf16.mxu0 %v1273_v1  ;;  %v1276_v3 = vld [vmem:[#allocation5 + $0x64] ss:$8 sps:$4 sm:$0xff]   ;;  %v1278_v4 = vld [vmem:[#allocation5 + $0x60] ss:$8 sps:$4 sm:$0xff]  }
  0x4c   :  { %210 = vmatpush1.bf16.msra.mxu0 %v1275_v2  ;;  %v1279_v5 = vld [vmem:[#allocation5 + $0x54] ss:$8 sps:$4 sm:$0xff]   ;;  %v1281_v6 = vld [vmem:[#allocation5 + $0x50] ss:$8 sps:$4 sm:$0xff]   ;;  %v1282_v7 = vld [vmem:[#allocation5 + $0x44] ss:$8 sps:$4 sm:$0xff]  }
  0x4d   :  { %211 = vmatprep.subr.bf16.mxu0 %v1276_v3  ;;  %v1284_v8 = vld [vmem:[#allocation5 + $0x40] ss:$8 sps:$4 sm:$0xff]   ;;  %v1285_v9 = vld [vmem:[#allocation5 + $0x34] ss:$8 sps:$4 sm:$0xff]   ;;  %v1299_v11 = vld [vmem:[#allocation7 + $0x70] ss:$8 sps:$4 sm:$0xff]  }
  0x4e   :  { %v1297_v10 = vld [vmem:[#allocation7 + $0x74] ss:$8 sps:$4 sm:$0xff]   ;;  %v1300_v12 = vld [vmem:[#allocation7 + $0x64] ss:$8 sps:$4 sm:$0xff]   ;;  %v1287_v13 = vld [vmem:[#allocation5 + $0x30] ss:$8 sps:$4 sm:$0xff]  }
  0x4f   :  { %488 = vmatprep.subr.bf16.mxu1 %v1297_v10  ;;  %v1302_v14 = vld [vmem:[#allocation7 + $0x60] ss:$8 sps:$4 sm:$0xff]   ;;  %v1303_v15 = vld [vmem:[#allocation7 + $0x54] ss:$8 sps:$4 sm:$0xff]   ;;  %v1288_v16 = vld [vmem:[#allocation5 + $0x24] ss:$8 sps:$4 sm:$0xff]  }
  0x50   :  { %212 = vmatpush1.bf16.msra.mxu0 %v1278_v4  ;;  %489 = vmatpush1.bf16.msra.mxu1 %v1299_v11  ;;  %v1290_v17 = vld [vmem:[#allocation5 + $0x20] ss:$8 sps:$4 sm:$0xff]   ;;  %v1305_v18 = vld [vmem:[#allocation7 + $0x50] ss:$8 sps:$4 sm:$0xff]   ;;  %v1306_v19 = vld [vmem:[#allocation7 + $0x44] ss:$8 sps:$4 sm:$0xff]  }
  0x51   :  { %213 = vmatprep.subr.bf16.mxu0 %v1279_v5  ;;  %490 = vmatprep.subr.bf16.mxu1 %v1300_v12  ;;  %v1291_v20 = vld [vmem:[#allocation5 + $0x14] ss:$8 sps:$4 sm:$0xff]   ;;  %v1293_v21 = vld [vmem:[#allocation5 + $0x10] ss:$8 sps:$4 sm:$0xff]   ;;  %v1308_v22 = vld [vmem:[#allocation7 + $0x40] ss:$8 sps:$4 sm:$0xff]   ;;  %v252_v12 = vlaneseq }
  0x52   :  { %v1309_v23 = vld [vmem:[#allocation7 + $0x34] ss:$8 sps:$4 sm:$0xff]   ;;  %v1294_v24 = vld [vmem:[#allocation5 + $0x4] ss:$8 sps:$4 sm:$0xff]   ;;  %v1296_v25 = vld [vmem:[#allocation5] ss:$8 sps:$4 sm:$0xff]  }
  0x53   :  { %v1311_v26 = vld [vmem:[#allocation7 + $0x30] ss:$8 sps:$4 sm:$0xff]   ;;  %v1312_v27 = vld [vmem:[#allocation7 + $0x24] ss:$8 sps:$4 sm:$0xff]   ;;  %v1314_v28 = vld [vmem:[#allocation7 + $0x20] ss:$8 sps:$4 sm:$0xff]  }
  0x54   :  { %214 = vmatpush1.bf16.msra.mxu0 %v1281_v6  ;;  %491 = vmatpush1.bf16.msra.mxu1 %v1302_v14  ;;  %v112_v29 = vld [vmem:[#allocation2] sm:$0xf]  ;;  %v1317_v31 = vld [vmem:[#allocation7 + $0x10] ss:$8 sps:$4 sm:$0xff]   ;;  %v1318_v32 = vld [vmem:[#allocation7 + $0x4] ss:$8 sps:$4 sm:$0xff]  }
  0x55   :  { %215 = vmatprep.subr.bf16.mxu0 %v1282_v7  ;;  %492 = vmatprep.subr.bf16.mxu1 %v1303_v15  ;;  %v1315_v30 = vld [vmem:[#allocation7 + $0x14] ss:$8 sps:$4 sm:$0xff]   ;;  %v1320_v33 = vld [vmem:[#allocation7] ss:$8 sps:$4 sm:$0xff]   ;;  %v1323_v35 = vld [vmem:[#allocation7 + $0xf0] ss:$8 sps:$4 sm:$0xff]  }
  0x56   :  { %v1321_v34 = vld [vmem:[#allocation7 + $0xf4] ss:$8 sps:$4 sm:$0xff]   ;;  %v1324_v36 = vld [vmem:[#allocation7 + $0xe4] ss:$8 sps:$4 sm:$0xff]   ;;  %v1326_v37 = vld [vmem:[#allocation7 + $0xe0] ss:$8 sps:$4 sm:$0xff]  }
  0x57   :  { %v1327_v38 = vld [vmem:[#allocation7 + $0xd4] ss:$8 sps:$4 sm:$0xff]   ;;  %v1329_v39 = vld [vmem:[#allocation7 + $0xd0] ss:$8 sps:$4 sm:$0xff]   ;;  %v1330_v40 = vld [vmem:[#allocation7 + $0xc4] ss:$8 sps:$4 sm:$0xff]  }
  0x58   :  { %216 = vmatpush1.bf16.msra.mxu0 %v1284_v8  ;;  %493 = vmatpush1.bf16.msra.mxu1 %v1305_v18  ;;  %v1332_v41 = vld [vmem:[#allocation7 + $0xc0] ss:$8 sps:$4 sm:$0xff]   ;;  %v1333_v42 = vld [vmem:[#allocation7 + $0xb4] ss:$8 sps:$4 sm:$0xff]   ;;  %v1335_v43 = vld [vmem:[#allocation7 + $0xb0] ss:$8 sps:$4 sm:$0xff]  }
  0x59   :  { %217 = vmatprep.subr.bf16.mxu0 %v1285_v9  ;;  %494 = vmatprep.subr.bf16.mxu1 %v1306_v19  ;;  %v1336_v44 = vld [vmem:[#allocation7 + $0xa4] ss:$8 sps:$4 sm:$0xff]   ;;  %v1338_v45 = vld [vmem:[#allocation7 + $0xa0] ss:$8 sps:$4 sm:$0xff]   ;;  %v1339_v46 = vld [vmem:[#allocation7 + $0x94] ss:$8 sps:$4 sm:$0xff]  }
  0x5a   :  { %v1341_v47 = vld [vmem:[#allocation7 + $0x90] ss:$8 sps:$4 sm:$0xff]   ;;  %v1342_v48 = vld [vmem:[#allocation7 + $0x84] ss:$8 sps:$4 sm:$0xff]   ;;  %v1344_v49 = vld [vmem:[#allocation7 + $0x80] ss:$8 sps:$4 sm:$0xff]  }
  0x5b   :  { %v1345_v50 = vld [vmem:[#allocation8 + $0x70] ss:$8 sps:$4 sm:$0xff]   ;;  %v1347_v51 = vld [vmem:[#allocation8 + $0x74] ss:$8 sps:$4 sm:$0xff]   ;;  %v1350_v52 = vld [vmem:[#allocation8 + $0x64] ss:$8 sps:$4 sm:$0xff]  }
  0x5c   :  { %218 = vmatpush1.bf16.msra.mxu0 %v1287_v13  ;;  %495 = vmatpush1.bf16.msra.mxu1 %v1308_v22  ;;  %v1348_v53 = vld [vmem:[#allocation8 + $0x60] ss:$8 sps:$4 sm:$0xff]   ;;  %v1353_v54 = vld [vmem:[#allocation8 + $0x54] ss:$8 sps:$4 sm:$0xff]   ;;  %v1351_v55 = vld [vmem:[#allocation8 + $0x50] ss:$8 sps:$4 sm:$0xff]  }
  0x5d   :  { %219 = vmatprep.subr.bf16.mxu0 %v1288_v16  ;;  %496 = vmatprep.subr.bf16.mxu1 %v1309_v23  ;;  %v1356_v56 = vld [vmem:[#allocation8 + $0x44] ss:$8 sps:$4 sm:$0xff]   ;;  %v1354_v57 = vld [vmem:[#allocation8 + $0x40] ss:$8 sps:$4 sm:$0xff]   ;;  %v1359_v58 = vld [vmem:[#allocation8 + $0x34] ss:$8 sps:$4 sm:$0xff]  }
  0x5e   :  { %v1357_v59 = vld [vmem:[#allocation8 + $0x30] ss:$8 sps:$4 sm:$0xff]   ;;  %v1362_v60 = vld [vmem:[#allocation8 + $0x24] ss:$8 sps:$4 sm:$0xff]   ;;  %v1360_v61 = vld [vmem:[#allocation8 + $0x20] ss:$8 sps:$4 sm:$0xff]  }
  0x5f   :  { %v1365_v62 = vld [vmem:[#allocation8 + $0x14] ss:$8 sps:$4 sm:$0xff]   ;;  %v1363_v63 = vld [vmem:[#allocation8 + $0x10] ss:$8 sps:$4 sm:$0xff]   ;;  %v1368_v0 = vld [vmem:[#allocation8 + $0x4] ss:$8 sps:$4 sm:$0xff]  }
  0x60   :  { %220 = vmatpush1.bf16.msra.mxu0 %v1290_v17  ;;  %497 = vmatpush1.bf16.msra.mxu1 %v1311_v26  ;;  %v1366_v1 = vld [vmem:[#allocation8] ss:$8 sps:$4 sm:$0xff]   ;;  %v1371_v2 = vld [vmem:[#allocation8 + $0xf4] ss:$8 sps:$4 sm:$0xff]   ;;  %v1369_v3 = vld [vmem:[#allocation8 + $0xf0] ss:$8 sps:$4 sm:$0xff]  }
  0x61   :  { %221 = vmatprep.subr.bf16.mxu0 %v1291_v20  ;;  %498 = vmatprep.subr.bf16.mxu1 %v1312_v27  ;;  %v1374_v4 = vld [vmem:[#allocation8 + $0xe4] ss:$8 sps:$4 sm:$0xff]   ;;  %v1372_v5 = vld [vmem:[#allocation8 + $0xe0] ss:$8 sps:$4 sm:$0xff]   ;;  %v1377_v6 = vld [vmem:[#allocation8 + $0xd4] ss:$8 sps:$4 sm:$0xff]  }
  0x62   :  { %v1375_v7 = vld [vmem:[#allocation8 + $0xd0] ss:$8 sps:$4 sm:$0xff]   ;;  %v1380_v8 = vld [vmem:[#allocation8 + $0xc4] ss:$8 sps:$4 sm:$0xff]   ;;  %v1378_v9 = vld [vmem:[#allocation8 + $0xc0] ss:$8 sps:$4 sm:$0xff]  }
  0x63   :  { %v1383_v10 = vld [vmem:[#allocation8 + $0xb4] ss:$8 sps:$4 sm:$0xff]   ;;  %v1381_v11 = vld [vmem:[#allocation8 + $0xb0] ss:$8 sps:$4 sm:$0xff]   ;;  %v253_v13 = vshrl.u32 %v252_v12, 7 }
  0x64   :  { %222 = vmatpush1.bf16.msra.mxu0 %v1293_v21  ;;  %499 = vmatpush1.bf16.msra.mxu1 %v1314_v28  ;;  %v250_v15 = vld [vmem:[%s1738_s5] sm:$0xf] }
  0x65   :  { %223 = vmatprep.subr.bf16.mxu0 %v1294_v24  ;;  %500 = vmatprep.subr.bf16.mxu1 %v1315_v30  ;;  %v1681_v14 = vsub.s32 0, %v253_v13  ;;  %v1686_v16 = vsub.s32 1, %v253_v13  ;;  %v1688_v17 = vsub.s32 2, %v253_v13  ;;  %v1691_v19 = vsub.s32 3, %v253_v13 }
  0x67   :  { %v255_v18 = vrot.slane %v250_v15, %v1681_v14  ;;  %v275_v20 = vrot.slane %v250_v15, %v1686_v16  ;;  %v259_v21 = vrot.slane %v250_v15, %v1688_v17  ;;  %v279_v23 = vrot.slane %v250_v15, %v1691_v19 }
  0x68   :  { %224 = vmatpush1.bf16.msra.mxu0 %v1296_v25  ;;  %501 = vmatpush1.bf16.msra.mxu1 %v1317_v31 }
  0x69   :  { %502 = vmatprep.subr.bf16.mxu1 %v1318_v32  ;;  %767 = vmatprep.subr.bf16.mxu0 %v1347_v51  ;;  %v265_v22 = vrot.slane %v255_v18, %v1681_v14  ;;  %v285_v24 = vrot.slane %v275_v20, %v1686_v16  ;;  %v269_v25 = vrot.slane %v259_v21, %v1681_v14  ;;  %v1404_v51 = vld [vmem:[#allocation10 + $0x44] ss:$8 sps:$4 sm:$0xff]  }
  0x6a   :  { %v289_v28 = vrot.slane %v279_v23, %v1686_v16 }
  0x6b   :  { %242 = vmatmul.mubr.bf16.vlgmr.msra.gmra.mxu0 %v112_v29 }
  0x6c   :  { %503 = vmatpush1.bf16.msra.mxu1 %v1320_v33  ;;  %768 = vmatpush1.bf16.msra.mxu0 %v1345_v50  ;;  %v1399_v50 = vld [vmem:[#allocation10 + $0x50] ss:$8 sps:$4 sm:$0xff]  }
  0x6d   :  { %504 = vmatprep.subr.bf16.mxu1 %v1321_v34  ;;  %769 = vmatprep.subr.bf16.mxu0 %v1350_v52  ;;  %v1402_v52 = vld [vmem:[#allocation10 + $0x40] ss:$8 sps:$4 sm:$0xff]  }
  0x70   :  { %505 = vmatpush2.bf16.msra.mxu1 %v1323_v35  ;;  %770 = vmatpush1.bf16.msra.mxu0 %v1348_v53  ;;  %v1407_v53 = vld [vmem:[#allocation10 + $0x34] ss:$8 sps:$4 sm:$0xff]  }
  0x71   :  { %506 = vmatprep.subr.bf16.mxu1 %v1324_v36  ;;  %771 = vmatprep.subr.bf16.mxu0 %v1353_v54  ;;  %v1405_v54 = vld [vmem:[#allocation10 + $0x30] ss:$8 sps:$4 sm:$0xff]  }
  0x74   :  { %507 = vmatpush2.bf16.msra.mxu1 %v1326_v37  ;;  %772 = vmatpush1.bf16.msra.mxu0 %v1351_v55  ;;  %v1410_v55 = vld [vmem:[#allocation10 + $0x24] ss:$8 sps:$4 sm:$0xff]  }
  0x75   :  { %508 = vmatprep.subr.bf16.mxu1 %v1327_v38  ;;  %773 = vmatprep.subr.bf16.mxu0 %v1356_v56  ;;  %v1408_v56 = vld [vmem:[#allocation10 + $0x20] ss:$8 sps:$4 sm:$0xff]  }
  0x78   :  { %509 = vmatpush2.bf16.msra.mxu1 %v1329_v39  ;;  %774 = vmatpush1.bf16.msra.mxu0 %v1354_v57  ;;  %v1386_v39 = vld [vmem:[#allocation8 + $0xa4] ss:$8 sps:$4 sm:$0xff]   ;;  %v1413_v57 = vld [vmem:[#allocation10 + $0x14] ss:$8 sps:$4 sm:$0xff]  }
  0x79   :  { %510 = vmatprep.subr.bf16.mxu1 %v1330_v40  ;;  %775 = vmatprep.subr.bf16.mxu0 %v1359_v58  ;;  %v1384_v40 = vld [vmem:[#allocation8 + $0xa0] ss:$8 sps:$4 sm:$0xff]   ;;  %v1411_v58 = vld [vmem:[#allocation10 + $0x10] ss:$8 sps:$4 sm:$0xff]  }
  0x7c   :  { %511 = vmatpush2.bf16.msra.mxu1 %v1332_v41  ;;  %776 = vmatpush1.bf16.msra.mxu0 %v1357_v59  ;;  %v1389_v41 = vld [vmem:[#allocation8 + $0x94] ss:$8 sps:$4 sm:$0xff]   ;;  %v1416_v59 = vld [vmem:[#allocation10 + $0x4] ss:$8 sps:$4 sm:$0xff]  }
  0x7d   :  { %512 = vmatprep.subr.bf16.mxu1 %v1333_v42  ;;  %777 = vmatprep.subr.bf16.mxu0 %v1362_v60  ;;  %v1387_v42 = vld [vmem:[#allocation8 + $0x90] ss:$8 sps:$4 sm:$0xff]   ;;  %v1414_v60 = vld [vmem:[#allocation10] ss:$8 sps:$4 sm:$0xff]  }
  0x80   :  { %513 = vmatpush2.bf16.msra.mxu1 %v1335_v43  ;;  %778 = vmatpush1.bf16.msra.mxu0 %v1360_v61  ;;  %v1392_v43 = vld [vmem:[#allocation8 + $0x84] ss:$8 sps:$4 sm:$0xff]   ;;  %v1419_v61 = vld [vmem:[#allocation10 + $0xf4] ss:$8 sps:$4 sm:$0xff]  }
  0x81   :  { %514 = vmatprep.subr.bf16.mxu1 %v1336_v44  ;;  %779 = vmatprep.subr.bf16.mxu0 %v1365_v62  ;;  %v1390_v44 = vld [vmem:[#allocation8 + $0x80] ss:$8 sps:$4 sm:$0xff]   ;;  %v1417_v62 = vld [vmem:[#allocation10 + $0xf0] ss:$8 sps:$4 sm:$0xff]  }
  0x84   :  { %515 = vmatpush2.bf16.msra.mxu1 %v1338_v45  ;;  %780 = vmatpush1.bf16.msra.mxu0 %v1363_v63  ;;  %v1393_v45 = vld [vmem:[#allocation10 + $0x70] ss:$8 sps:$4 sm:$0xff]   ;;  %v1422_v63 = vld [vmem:[#allocation10 + $0xe4] ss:$8 sps:$4 sm:$0xff]  }
  0x85   :  { %516 = vmatprep.subr.bf16.mxu1 %v1339_v46  ;;  %781 = vmatprep.subr.bf16.mxu0 %v1368_v0  ;;  %v1395_v46 = vld [vmem:[#allocation10 + $0x74] ss:$8 sps:$4 sm:$0xff]   ;;  %v1420_v0 = vld [vmem:[#allocation10 + $0xe0] ss:$8 sps:$4 sm:$0xff]  }
  0x88   :  { %517 = vmatpush2.bf16.msra.mxu1 %v1341_v47  ;;  %782 = vmatpush1.bf16.msra.mxu0 %v1366_v1  ;;  %v1398_v47 = vld [vmem:[#allocation10 + $0x64] ss:$8 sps:$4 sm:$0xff]   ;;  %v1425_v1 = vld [vmem:[#allocation10 + $0xd4] ss:$8 sps:$4 sm:$0xff]  }
  0x89   :  { %518 = vmatprep.subr.bf16.mxu1 %v1342_v48  ;;  %783 = vmatprep.subr.bf16.mxu0 %v1371_v2  ;;  %v1396_v48 = vld [vmem:[#allocation10 + $0x60] ss:$8 sps:$4 sm:$0xff]   ;;  %v1423_v2 = vld [vmem:[#allocation10 + $0xd0] ss:$8 sps:$4 sm:$0xff]  }
  0x8c   :  { %519 = vmatpush2.bf16.msra.mxu1 %v1344_v49  ;;  %784 = vmatpush2.bf16.msra.mxu0 %v1369_v3  ;;  %v1401_v49 = vld [vmem:[#allocation10 + $0x54] ss:$8 sps:$4 sm:$0xff]   ;;  %v1428_v3 = vld [vmem:[#allocation10 + $0xc4] ss:$8 sps:$4 sm:$0xff]  }
  0x8d   :  { %785 = vmatprep.subr.bf16.mxu0 %v1374_v4  ;;  %1046 = vmatprep.subr.bf16.mxu1 %v1395_v46  ;;  %v1426_v4 = vld [vmem:[#allocation10 + $0xc0] ss:$8 sps:$4 sm:$0xff]  }
  0x90   :  { %786 = vmatpush2.bf16.msra.mxu0 %v1372_v5  ;;  %v1431_v5 = vld [vmem:[#allocation10 + $0xb4] ss:$8 sps:$4 sm:$0xff]  }
  0x91   :  { %787 = vmatprep.subr.bf16.mxu0 %v1377_v6  ;;  %v1429_v6 = vld [vmem:[#allocation10 + $0xb0] ss:$8 sps:$4 sm:$0xff]  }
  0x94   :  { %788 = vmatpush2.bf16.msra.mxu0 %v1375_v7  ;;  %v529_v7 = vld [vmem:[%s1739_s6] sm:$0xf] }
  0x95   :  { %789 = vmatprep.subr.bf16.mxu0 %v1380_v8  ;;  %v534_v8 = vrot.slane %v529_v7, %v1681_v14  ;;  %v558_v12 = vrot.slane %v529_v7, %v1691_v19 }
  0x97   :  { %v568_v21 = vrot.slane %v558_v12, %v1686_v16 }
  0x98   :  { %790 = vmatpush2.bf16.msra.mxu0 %v1378_v9  ;;  %v554_v9 = vrot.slane %v529_v7, %v1686_v16 }
  0x99   :  { %791 = vmatprep.subr.bf16.mxu0 %v1383_v10  ;;  %v538_v10 = vrot.slane %v529_v7, %v1688_v17 }
  0x9a   :  { %v564_v13 = vrot.slane %v554_v9, %v1686_v16 }
  0x9b   :  { %v548_v15 = vrot.slane %v538_v10, %v1681_v14 }
  0x9c   :  { %792 = vmatpush2.bf16.msra.mxu0 %v1381_v11  ;;  %v544_v11 = vrot.slane %v534_v8, %v1681_v14 }
  0x9d   :  { %793 = vmatprep.subr.bf16.mxu0 %v1386_v39 }
  0xa0   :  { %794 = vmatpush2.bf16.msra.mxu0 %v1384_v40 }
  0xa1   :  { %795 = vmatprep.subr.bf16.mxu0 %v1389_v41 }
  0xa4   :  { %796 = vmatpush2.bf16.msra.mxu0 %v1387_v42 }
  0xa5   :  { %797 = vmatprep.subr.bf16.mxu0 %v1392_v43 }
  0xa8   :  { %798 = vmatpush2.bf16.msra.mxu0 %v1390_v44 }
 0x12b   :  { %v243_v26 = vpop.f32.mrf.mxu0 }
 0x12c   :  { %v270_v27 = vmul.f32 %v265_v22, %v243_v26 }
 0x12d   :  { %v245_v29 = vpop.f32.mrf.mxu0 }
 0x12e   :  { %v290_v30 = vadd.f32 %v285_v24, %v270_v27  ;;  %v271_v31 = vmul.f32 %v269_v25, %v245_v29 }
 0x12f   :  { %v247_v32 = vpop.f32.mrf.mxu0 }
 0x130   :  { %v291_v33 = vadd.f32 %v289_v28, %v271_v31  ;;  %v292_v34 = vmax.f32 %v290_v30, 0.0  ;;  %v1434_v32 = vld [vmem:[#allocation10 + $0xa4] ss:$8 sps:$4 sm:$0xff]  }
 0x131   :  { %v248_v35 = vpop.f32.mrf.mxu0 }
 0x132   :  { %v293_v36 = vmax.f32 %v291_v33, 0.0  ;;  %v294_v38 = vpack.c.bf16 %v292_v34, %v292_v34  ;;  %v1432_v33 = vld [vmem:[#allocation10 + $0xa0] ss:$8 sps:$4 sm:$0xff]   ;;  %v1437_v34 = vld [vmem:[#allocation10 + $0x94] ss:$8 sps:$4 sm:$0xff]  }
 0x133   :  { %v1435_v35 = vld [vmem:[#allocation10 + $0x90] ss:$8 sps:$4 sm:$0xff]  }
 0x134   :  { %v295_v37 = vpack.c.bf16 %v293_v36, %v293_v36  ;;  %v1440_v36 = vld [vmem:[#allocation10 + $0x84] ss:$8 sps:$4 sm:$0xff]  }
 0x136   :  { %520 = vmatprep.mubr.bf16.mxu1 %v295_v37  ;;  %v1438_v37 = vld [vmem:[#allocation10 + $0x80] ss:$8 sps:$4 sm:$0xff]  }
 0x137   :  { %521 = vmatmul.mubr.bf16.vlgmr.msra.gmra.mxu1 %v294_v38  ;;  %v808_v38 = vld [vmem:[%s1740_s7] sm:$0xf]  ;;  %s1600_s7 = smov [#allocation13]  }
 0x138   :  { %1047 = vmatpush1.bf16.msra.mxu1 %v1393_v45  ;;  %v813_v39 = vrot.slane %v808_v38, %v1681_v14  ;;  %v833_v40 = vrot.slane %v808_v38, %v1686_v16  ;;  %v817_v41 = vrot.slane %v808_v38, %v1688_v17  ;;  %v837_v43 = vrot.slane %v808_v38, %v1691_v19  ;;  %s1139_s18 = sshll.u32 %s1600_s7, 4  ;;  %s1140_s18 = int_to_ptr.vmem [resolvable:$true] %s1139_s18 }
 0x139   :  { %1048 = vmatprep.subr.bf16.mxu1 %v1398_v47  ;;  %s1561_s19 = scalar_lea.vmem %s1140_s18, 256  ;;  %p1566_p3 = scmp.lt.s32.totalorder %s1140_s18, %s1140_s18 }
 0x13a   :  { %v823_v42 = vrot.slane %v813_v39, %v1681_v14  ;;  %v843_v44 = vrot.slane %v833_v40, %v1686_v16  ;;  %v827_v45 = vrot.slane %v817_v41, %v1681_v14  ;;  %p1562_p2 = scmp.ne.s32.totalorder %s1140_s18, %s1561_s19  ;;  %p1567_p4 = scmp.lt.s32.totalorder %s1561_s19, %s1561_s19 }
 0x13c   :  { %1049 = vmatpush1.bf16.msra.mxu1 %v1396_v48  ;;  %v847_v48 = vrot.slane %v837_v43, %v1686_v16  ;;  %p1568_p5 = por %p1567_p4, %p1566_p3 }
 0x13d   :  { %1050 = vmatprep.subr.bf16.mxu1 %v1401_v49 }
 0x13e   :  { %p1569_p6 = pnand %p1568_p5, %p1562_p2 }
 0x140   :  { %1051 = vmatpush1.bf16.msra.mxu1 %v1399_v50 }
 0x141   :  { %1052 = vmatprep.subr.bf16.mxu1 %v1404_v51 }
 0x144   :  { %1053 = vmatpush1.bf16.msra.mxu1 %v1402_v52 }
 0x145   :  { %1054 = vmatprep.subr.bf16.mxu1 %v1407_v53 }
 0x148   :  { %1055 = vmatpush1.bf16.msra.mxu1 %v1405_v54 }
 0x149   :  { %1056 = vmatprep.subr.bf16.mxu1 %v1410_v55 }
 0x14c   :  { %1057 = vmatpush1.bf16.msra.mxu1 %v1408_v56 }
 0x14d   :  { %1058 = vmatprep.subr.bf16.mxu1 %v1413_v57 }
 0x150   :  { %1059 = vmatpush1.bf16.msra.mxu1 %v1411_v58 }
 0x151   :  { %1060 = vmatprep.subr.bf16.mxu1 %v1416_v59  ;;  %v1087_v59 = vld [vmem:[#allocation11] sm:$0xf] }
 0x154   :  { %1061 = vmatpush1.bf16.msra.mxu1 %v1414_v60  ;;  %v1092_v60 = vrot.slane %v1087_v59, %v1681_v14 }
 0x155   :  { %1062 = vmatprep.subr.bf16.mxu1 %v1419_v61  ;;  %v1112_v61 = vrot.slane %v1087_v59, %v1686_v16 }
 0x158   :  { %1063 = vmatpush2.bf16.msra.mxu1 %v1417_v62  ;;  %v1096_v62 = vrot.slane %v1087_v59, %v1688_v17 }
 0x159   :  { %1064 = vmatprep.subr.bf16.mxu1 %v1422_v63  ;;  %v1102_v63 = vrot.slane %v1092_v60, %v1681_v14 }
 0x15c   :  { %1065 = vmatpush2.bf16.msra.mxu1 %v1420_v0  ;;  %v1116_v0 = vrot.slane %v1087_v59, %v1691_v19 }
 0x15d   :  { %1066 = vmatprep.subr.bf16.mxu1 %v1425_v1  ;;  %v1122_v1 = vrot.slane %v1112_v61, %v1686_v16 }
 0x160   :  { %1067 = vmatpush2.bf16.msra.mxu1 %v1423_v2  ;;  %v1106_v2 = vrot.slane %v1096_v62, %v1681_v14 }
 0x161   :  { %1068 = vmatprep.subr.bf16.mxu1 %v1428_v3 }
 0x164   :  { %1069 = vmatpush2.bf16.msra.mxu1 %v1426_v4 }
 0x165   :  { %1070 = vmatprep.subr.bf16.mxu1 %v1431_v5  ;;  %v1126_v5 = vrot.slane %v1116_v0, %v1686_v16 }
 0x168   :  { %1071 = vmatpush2.bf16.msra.mxu1 %v1429_v6 }
 0x169   :  { %1072 = vmatprep.subr.bf16.mxu1 %v1434_v32 }
 0x16c   :  { %1073 = vmatpush2.bf16.msra.mxu1 %v1432_v33 }
 0x16d   :  { %1074 = vmatprep.subr.bf16.mxu1 %v1437_v34 }
 0x170   :  { %1075 = vmatpush2.bf16.msra.mxu1 %v1435_v35 }
 0x171   :  { %1076 = vmatprep.subr.bf16.mxu1 %v1440_v36 }
 0x174   :  { %1077 = vmatpush2.bf16.msra.mxu1 %v1438_v37 }
 0x1f7   :  { %v522_v18 = vpop.f32.mrf.mxu1 }
 0x1f8   :  { %v549_v20 = vmul.f32 %v544_v11, %v522_v18 }
 0x1f9   :  { %v524_v22 = vpop.f32.mrf.mxu1 }
 0x1fa   :  { %v569_v23 = vadd.f32 %v564_v13, %v549_v20  ;;  %v550_v24 = vmul.f32 %v548_v15, %v524_v22 }
 0x1fb   :  { %v526_v25 = vpop.f32.mrf.mxu1 }
 0x1fc   :  { %v570_v26 = vadd.f32 %v568_v21, %v550_v24  ;;  %v571_v27 = vmax.f32 %v569_v23, 0.0 }
 0x1fd   :  { %v527_v28 = vpop.f32.mrf.mxu1 }
 0x1fe   :  { %v572_v29 = vmax.f32 %v570_v26, 0.0  ;;  %v573_v31 = vpack.c.bf16 %v571_v27, %v571_v27 }
 0x200   :  { %v574_v30 = vpack.c.bf16 %v572_v29, %v572_v29 }
 0x202   :  { %799 = vmatprep.mubr.bf16.mxu0 %v574_v30 }
 0x203   :  { %800 = vmatmul.mubr.bf16.vlgmr.msra.gmra.mxu0 %v573_v31 }
 0x2c3   :  { %v801_v46 = vpop.f32.mrf.mxu0 }
 0x2c4   :  { %v828_v47 = vmul.f32 %v823_v42, %v801_v46 }
 0x2c5   :  { %v803_v49 = vpop.f32.mrf.mxu0 }
 0x2c6   :  { %v848_v50 = vadd.f32 %v843_v44, %v828_v47  ;;  %v829_v51 = vmul.f32 %v827_v45, %v803_v49 }
 0x2c7   :  { %v805_v52 = vpop.f32.mrf.mxu0 }
 0x2c8   :  { %v849_v53 = vadd.f32 %v847_v48, %v829_v51  ;;  %v850_v54 = vmax.f32 %v848_v50, 0.0 }
 0x2c9   :  { %v806_v55 = vpop.f32.mrf.mxu0 }
 0x2ca   :  { %v851_v56 = vmax.f32 %v849_v53, 0.0  ;;  %v852_v58 = vpack.c.bf16 %v850_v54, %v850_v54 }
 0x2cc   :  { %v853_v57 = vpack.c.bf16 %v851_v56, %v851_v56 }
 0x2ce   :  { %1078 = vmatprep.mubr.bf16.mxu1 %v853_v57 }
 0x2cf   :  { %1079 = vmatmul.mubr.bf16.vlgmr.msra.gmra.mxu1 %v852_v58 }
 0x38f   :  { %v1080_v3 = vpop.f32.mrf.mxu1 }
 0x390   :  { %v1107_v4 = vmul.f32 %v1102_v63, %v1080_v3 }
 0x391   :  { %v1082_v6 = vpop.f32.mrf.mxu1 }
 0x392   :  { %v1127_v7 = vadd.f32 %v1122_v1, %v1107_v4  ;;  %v1108_v8 = vmul.f32 %v1106_v2, %v1082_v6 }
 0x393   :  { %v1084_v9 = vpop.f32.mrf.mxu1 }
 0x394   :  { %v1129_v10 = vmax.f32 %v1127_v7, 0.0  ;;  %v1128_v17 = vadd.f32 %v1126_v5, %v1108_v8 }
 0x395   :  { %v1085_v11 = vpop.f32.mrf.mxu1 }
 0x396   :  { %1131 = vst [vmem:[#allocation13] sm:$0xff] %v1129_v10  ;;  %v1130_v12 = vmax.f32 %v1128_v17, 0.0 }
 0x398   :  { %1132 = vst [vmem:[#allocation13 + $0x8] sm:$0xff] %v1130_v12 }
 0x399   :  { %1572 = shalt.err (!%p1569_p6)
}
 0x39a   :  { %1142 = dma.vmem_to_hbm [thread:$0]  %s1140_s18, 256, %s1742_s9, [#allocation4]  }
 0x39b   :  { %1589 = dma.done.wait [#allocation4], 256  }
 0x39c   :  { %1590 = vsyncadd [#allocation4], 4294967040 }
 0x39d   :  { %1146 = vsyncpa [#allocation3], 1 }
 0x39e   :  { %1147 = vsyncpa [#allocation6], 1 }
 0x39f   :  { %1148 = vsyncpa [#allocation9], 1 }
 0x3a0   :  { %1149 = vsyncpa [#allocation12], 1 }
 0x3a1   :  { %1150 = vsyncpa [#allocation4], 1 }

</bundles_post_ra>
